<compile_context>
chip_gen: v7x
topology: tpu7x:2x2x1
jax: 0.10.0
libtpu: 0.0.40
codegen_flags: <defaults>
</compile_context>

<pallas_src>
from functools import partial

import jax
import jax.numpy as jnp
import numpy as np
from jax.experimental import pallas as pl
from jax.experimental.pallas import tpu as pltpu


# ----------------------------------------------------------------------------
# Fused Pallas kernel: stacked RNN + Linear head, one launch, batch-tiled grid
# ----------------------------------------------------------------------------
def make_fused_rnn_kernel(n_layers, T, TB):
    """Kernel refs: x_tile, [W_ih^T, W_hh^T, (b_ih+b_hh), h0] * n_layers,
       W_fc^T, b_fc, out_tile, hidden-seq scratch per intermediate layer."""

    def kernel(*refs):
        x_ref = refs[0]
        wfc_ref = refs[1 + 4 * n_layers]
        bfc_ref = refs[2 + 4 * n_layers]
        out_ref = refs[3 + 4 * n_layers]
        scratch = refs[4 + 4 * n_layers:]          # (T, TB, H_i) VMEM per layer<last

        h = None
        for i in range(n_layers):
            wih = refs[1 + 4 * i][...]             # (Din, H)  == W_ih^T
            whh = refs[2 + 4 * i][...]             # (H, H)    == W_hh^T
            b = refs[3 + 4 * i][...]               # (1, H)    == b_ih + b_hh
            h0 = refs[4 + 4 * i][...]              # (1, H)
            H = whh.shape[1]

            # ---- hoisted input projection: one large MXU matmul per layer ----
            # TODO(synk): at production H, cast these matmul operands to bf16
            # (f32 accumulate) on v6e/v7x and prefetch layer i+1 weights from
            # pl.ANY via make_async_copy; kept f32 + auto-DMA at these shapes.
            if i == 0:
                xin = x_ref[...]                                     # (TB, T, D)
                flat = xin.reshape(TB * T, xin.shape[-1])
                proj = jnp.dot(flat, wih,
                               preferred_element_type=jnp.float32) + b
                # single up-front relayout to time-major: recurrence then only
                # slices the leading dim (whole-vreg slab, no XLU per step)
                proj = jnp.transpose(proj.reshape(TB, T, H), (1, 0, 2))
            else:
                prev = scratch[i - 1][...]                           # (T, TB, Hp)
                flat = prev.reshape(T * TB, prev.shape[-1])
                proj = (jnp.dot(flat, wih,
                                preferred_element_type=jnp.float32) + b
                        ).reshape(T, TB, H)

            # ---- serial recurrence: one small matmul + tanh per step ---------
            # (W_hh is loop-invariant; Mosaic hoists the RHS staging out of the
            #  unrolled loop so only the accumulate+tanh sits on the chain.)
            h = jnp.broadcast_to(h0, (TB, H)).astype(jnp.float32)
            last = (i == n_layers - 1)
            for t in range(T):                     # static T, fully unrolled
                h = jnp.tanh(proj[t] + jnp.dot(
                    h, whh, preferred_element_type=jnp.float32))
                if not last:
                    scratch[i][t] = h              # bounded live range, no stack

        # ---- fused Linear head on final hidden state of the last layer ------
        out = jnp.dot(h, wfc_ref[...],
                      preferred_element_type=jnp.float32) + bfc_ref[...]
        out_ref[...] = out.astype(out_ref.dtype)

    return kernel


def _full_spec(shape):
    nd = len(shape)
    return pl.BlockSpec(tuple(shape), lambda i, nd=nd: (0,) * nd)


# ----------------------------------------------------------------------------
# One-time parameter prep: pre-transpose weights, pre-fold biases
# ----------------------------------------------------------------------------
def prepare_params(params):
    layers = []
    for (w_ih, w_hh, b_ih, b_hh), h0_buf in zip(params["rnn"], params["h0"]):
        layers.append((jnp.asarray(w_ih.T),              # (Din, H)
                       jnp.asarray(w_hh.T),              # (H, H)
                       (b_ih + b_hh)[None, :],           # (1, H)
                       h0_buf.reshape(1, -1)))           # (1, H)
    w_fc, b_fc = params["fc"]
    return {"layers": layers, "fc": (jnp.asarray(w_fc.T), b_fc[None, :])}


# ----------------------------------------------------------------------------
# Forward: single fused pallas_call, parallel batch-tile grid
# ----------------------------------------------------------------------------
@partial(jax.jit, static_argnames=("batch_tile",))
def rnn_model_forward(prepped, x, batch_tile=None):
    """x: (B, T, featureDim), batch_first — matches the PyTorch forward."""
    # TODO(synk): PackedSequence / variable-length inputs unsupported; dense only.
    B, T, D = x.shape
    layers = prepped["layers"]
    n_layers = len(layers)
    w_fc, b_fc = prepped["fc"]
    n_out = w_fc.shape[1]
    hidden = [whh.shape[1] for (_, whh, _, _) in layers]

    TB = B if batch_tile is None else int(batch_tile)
    assert B % TB == 0, "batch must be divisible by batch_tile"
    n_tiles = B // TB

    inputs = [x]
    for lyr in layers:
        inputs += list(lyr)
    inputs += [w_fc, b_fc]

    in_specs = [pl.BlockSpec((TB, T, D), lambda i: (i, 0, 0))]
    in_specs += [_full_spec(a.shape) for a in inputs[1:]]
    out_spec = pl.BlockSpec((TB, n_out), lambda i: (i, 0))

    scratch_shapes = [pltpu.VMEM((T, TB, h), jnp.float32) for h in hidden[:-1]]

    # Explicit VMEM budget: resident weights + hidden-seq scratch + working
    # projections, with headroom; clamped so it stays valid on v7x (64 MiB).
    raw_bytes = 4 * (TB * T * D
                     + sum(int(np.prod(a.shape)) for a in inputs[1:])
                     + TB * n_out
                     + sum(T * TB * h for h in hidden[:-1])     # scratch
                     + sum(T * TB * h for h in hidden))         # proj working set
    vmem_limit = int(min(max(4 * raw_bytes, 32 << 20), 64 << 20))

    return pl.pallas_call(
        make_fused_rnn_kernel(n_layers, T, TB),
        out_shape=jax.ShapeDtypeStruct((B, n_out), jnp.float32),
        grid_spec=pltpu.PrefetchScalarGridSpec(
            num_scalar_prefetch=0,
            grid=(n_tiles,),
            in_specs=in_specs,
            out_specs=out_spec,
            scratch_shapes=scratch_shapes,
        ),
        compiler_params=pltpu.CompilerParams(
            dimension_semantics=("parallel",),     # megacore sharding on v7x
            vmem_limit_bytes=vmem_limit),
    )(*inputs)


# ----------------------------------------------------------------------------
# Parameter construction (mirrors nn.RNN / nn.Linear init + registered buffers)
# ----------------------------------------------------------------------------
def init_params(key, feature_dim, state_dims, n_output):
    params = {"rnn": [], "h0": []}
    in_dim = feature_dim
    for i, H in enumerate(state_dims):
        key, k1, k2, k3, k4, k5 = jax.random.split(key, 6)
        bound = 1.0 / np.sqrt(H)
        w_ih = jax.random.uniform(k1, (H, in_dim), jnp.float32, -bound, bound)
        w_hh = jax.random.uniform(k2, (H, H), jnp.float32, -bound, bound)
        b_ih = jax.random.uniform(k3, (H,), jnp.float32, -bound, bound)
        b_hh = jax.random.uniform(k4, (H,), jnp.float32, -bound, bound)
        h0_buf = jax.random.normal(k5, (1, 1, H), jnp.float32)  # buffer layer{i+1}
        params["rnn"].append((w_ih, w_hh, b_ih, b_hh))
        params["h0"].append(h0_buf)
        in_dim = H
    key, k1, k2 = jax.random.split(key, 3)
    bound = 1.0 / np.sqrt(state_dims[-1])
    w_fc = jax.random.uniform(k1, (n_output, state_dims[-1]), jnp.float32, -bound, bound)
    b_fc = jax.random.uniform(k2, (n_output,), jnp.float32, -bound, bound)
    params["fc"] = (w_fc, b_fc)
    return params


# ----------------------------------------------------------------------------
# Pure-JAX reference (faithful to the PyTorch math) for the correctness check
# ----------------------------------------------------------------------------
def reference_forward(params, x):
    B = x.shape[0]
    res = x                                      # (B, T, D)
    h_last = None
    for (w_ih, w_hh, b_ih, b_hh), h0_buf in zip(params["rnn"], params["h0"]):
        H = h0_buf.shape[-1]
        h = jnp.broadcast_to(h0_buf[0, 0][None, :], (B, H))
        outs = []
        for t in range(res.shape[1]):
            h = jnp.tanh(res[:, t, :] @ w_ih.T + b_ih + h @ w_hh.T + b_hh)
            outs.append(h)
        res = jnp.stack(outs, axis=1)
        h_last = h
    w_fc, b_fc = params["fc"]
    return h_last @ w_fc.T + b_fc


# ----------------------------------------------------------------------------
if __name__ == "__main__":
    # Small, module-consistent shapes (batch a sublane multiple; 2 batch tiles
    # exercise the parallel grid axis).
    B, T = 16, 8
    featureDim = 16
    stateDimension = [32, 32]   # numLayers = 2
    nOutputFeatures = 8

    key = jax.random.PRNGKey(0)
    kp, kx = jax.random.split(key)
    params = init_params(kp, featureDim, stateDimension, nOutputFeatures)
    x = jax.random.normal(kx, (B, T, featureDim), jnp.float32)

    prepped = prepare_params(params)            # one-time weight transpose/fold
    out = rnn_model_forward(prepped, x, batch_tile=8)
    out = jax.block_until_ready(out)

    ref = reference_forward(params, x)
    np.testing.assert_allclose(np.asarray(out), np.asarray(ref),
                               rtol=1e-4, atol=1e-4)
    assert out.shape == (B, nOutputFeatures)
    print("KERNEL_OK")
</pallas_src>

<mosaic_0001>
module attributes {stable_mosaic.version = 11 : i64} {
  func.func @kernel(%arg0: i32, %arg1: memref<8x8x16xf32, #tpu.memory_space<vmem>>, %arg2: memref<16x32xf32, #tpu.memory_space<vmem>>, %arg3: memref<32x32xf32, #tpu.memory_space<vmem>>, %arg4: memref<1x32xf32, #tpu.memory_space<vmem>>, %arg5: memref<1x32xf32, #tpu.memory_space<vmem>>, %arg6: memref<32x32xf32, #tpu.memory_space<vmem>>, %arg7: memref<32x32xf32, #tpu.memory_space<vmem>>, %arg8: memref<1x32xf32, #tpu.memory_space<vmem>>, %arg9: memref<1x32xf32, #tpu.memory_space<vmem>>, %arg10: memref<32x8xf32, #tpu.memory_space<vmem>>, %arg11: memref<1x8xf32, #tpu.memory_space<vmem>>, %arg12: memref<8x8xf32, #tpu.memory_space<vmem>>, %arg13: memref<8x8x32xf32, #tpu.memory_space<vmem>>) attributes {dimension_semantics = [#tpu.dimension_semantics<parallel>], iteration_bounds = array<i64: 2>, scalar_prefetch = 0 : i64, scratch_operands = 1 : i64, tpu.core_type = #tpu.core_type<tc>, window_params = [{transform_indices = @transform_0, window_bounds = array<i64: 8, 8, 16>}, {pipeline_mode = #tpu.pipeline_mode<synchronous>, transform_indices = @transform_1, window_bounds = array<i64: 16, 32>}, {pipeline_mode = #tpu.pipeline_mode<synchronous>, transform_indices = @transform_2, window_bounds = array<i64: 32, 32>}, {pipeline_mode = #tpu.pipeline_mode<synchronous>, transform_indices = @transform_3, window_bounds = array<i64: 1, 32>}, {pipeline_mode = #tpu.pipeline_mode<synchronous>, transform_indices = @transform_4, window_bounds = array<i64: 1, 32>}, {pipeline_mode = #tpu.pipeline_mode<synchronous>, transform_indices = @transform_5, window_bounds = array<i64: 32, 32>}, {pipeline_mode = #tpu.pipeline_mode<synchronous>, transform_indices = @transform_6, window_bounds = array<i64: 32, 32>}, {pipeline_mode = #tpu.pipeline_mode<synchronous>, transform_indices = @transform_7, window_bounds = array<i64: 1, 32>}, {pipeline_mode = #tpu.pipeline_mode<synchronous>, transform_indices = @transform_8, window_bounds = array<i64: 1, 32>}, {pipeline_mode = #tpu.pipeline_mode<synchronous>, transform_indices = @transform_9, window_bounds = array<i64: 32, 8>}, {pipeline_mode = #tpu.pipeline_mode<synchronous>, transform_indices = @transform_10, window_bounds = array<i64: 1, 8>}, {transform_indices = @transform_11, window_bounds = array<i64: 8, 8>}]} {
    %c0 = arith.constant 0 : index
    %c0_0 = arith.constant 0 : index
    %0 = vector.load %arg2[%c0, %c0_0] : memref<16x32xf32, #tpu.memory_space<vmem>>, vector<16x32xf32>
    %c0_1 = arith.constant 0 : index
    %c0_2 = arith.constant 0 : index
    %1 = vector.load %arg3[%c0_1, %c0_2] : memref<32x32xf32, #tpu.memory_space<vmem>>, vector<32x32xf32>
    %c0_3 = arith.constant 0 : index
    %c0_4 = arith.constant 0 : index
    %2 = vector.load %arg4[%c0_3, %c0_4] : memref<1x32xf32, #tpu.memory_space<vmem>>, vector<1x32xf32>
    %c0_5 = arith.constant 0 : index
    %c0_6 = arith.constant 0 : index
    %3 = vector.load %arg5[%c0_5, %c0_6] : memref<1x32xf32, #tpu.memory_space<vmem>>, vector<1x32xf32>
    %c0_7 = arith.constant 0 : index
    %c0_8 = arith.constant 0 : index
    %c0_9 = arith.constant 0 : index
    %4 = vector.load %arg1[%c0_7, %c0_8, %c0_9] : memref<8x8x16xf32, #tpu.memory_space<vmem>>, vector<8x8x16xf32>
    %5 = vector.shape_cast %4 : vector<8x8x16xf32> to vector<64x16xf32>
    %cst = arith.constant dense<0.000000e+00> : vector<64x32xf32>
    %6 = tpu.matmul %5, %0, %cst {dimension_numbers = #tpu.dot_dimension_numbers<[1], [0], [0], [1], [0, 0, 1, 1], [], []>} : vector<64x16xf32>, vector<16x32xf32>, vector<64x32xf32> -> vector<64x32xf32>
    %7 = vector.broadcast %2 : vector<1x32xf32> to vector<64x32xf32>
    %8 = arith.addf %6, %7 : vector<64x32xf32>
    %9 = vector.shape_cast %8 : vector<64x32xf32> to vector<8x8x32xf32>
    %10 = tpu.transpose %9, [1, 0, 2] : vector<8x8x32xf32> -> vector<8x8x32xf32>
    %11 = vector.shape_cast %3 : vector<1x32xf32> to vector<1x32xf32>
    %12 = vector.broadcast %11 : vector<1x32xf32> to vector<8x32xf32>
    %13 = vector.extract_strided_slice %10 {offsets = [0, 0, 0], sizes = [1, 8, 32], strides = [1, 1, 1]} : vector<8x8x32xf32> to vector<1x8x32xf32>
    %14 = vector.shape_cast %13 : vector<1x8x32xf32> to vector<8x32xf32>
    %cst_10 = arith.constant dense<0.000000e+00> : vector<8x32xf32>
    %15 = tpu.matmul %12, %1, %cst_10 {dimension_numbers = #tpu.dot_dimension_numbers<[1], [0], [0], [1], [0, 0, 1, 1], [], []>} : vector<8x32xf32>, vector<32x32xf32>, vector<8x32xf32> -> vector<8x32xf32>
    %16 = arith.addf %14, %15 : vector<8x32xf32>
    %17 = math.tanh %16 : vector<8x32xf32>
    %c0_11 = arith.constant 0 : index
    %c0_12 = arith.constant 0 : index
    %c0_13 = arith.constant 0 : index
    %18 = vector.load %arg13[%c0_11, %c0_12, %c0_13] : memref<8x8x32xf32, #tpu.memory_space<vmem>>, vector<1x8x32xf32>
    %19 = vector.shape_cast %18 : vector<1x8x32xf32> to vector<8x32xf32>
    %20 = vector.shape_cast %17 : vector<8x32xf32> to vector<1x8x32xf32>
    tpu.vector_store %arg13[%c0_11, %c0_12, %c0_13], %20 {strides = array<i32>} : memref<8x8x32xf32, #tpu.memory_space<vmem>>, vector<1x8x32xf32>,
    %21 = vector.extract_strided_slice %10 {offsets = [1, 0, 0], sizes = [1, 8, 32], strides = [1, 1, 1]} : vector<8x8x32xf32> to vector<1x8x32xf32>
    %22 = vector.shape_cast %21 : vector<1x8x32xf32> to vector<8x32xf32>
    %cst_14 = arith.constant dense<0.000000e+00> : vector<8x32xf32>
    %23 = tpu.matmul %17, %1, %cst_14 {dimension_numbers = #tpu.dot_dimension_numbers<[1], [0], [0], [1], [0, 0, 1, 1], [], []>} : vector<8x32xf32>, vector<32x32xf32>, vector<8x32xf32> -> vector<8x32xf32>
    %24 = arith.addf %22, %23 : vector<8x32xf32>
    %25 = math.tanh %24 : vector<8x32xf32>
    %c1 = arith.constant 1 : index
    %c0_15 = arith.constant 0 : index
    %c0_16 = arith.constant 0 : index
    %26 = vector.load %arg13[%c1, %c0_15, %c0_16] : memref<8x8x32xf32, #tpu.memory_space<vmem>>, vector<1x8x32xf32>
    %27 = vector.shape_cast %26 : vector<1x8x32xf32> to vector<8x32xf32>
    %28 = vector.shape_cast %25 : vector<8x32xf32> to vector<1x8x32xf32>
    tpu.vector_store %arg13[%c1, %c0_15, %c0_16], %28 {strides = array<i32>} : memref<8x8x32xf32, #tpu.memory_space<vmem>>, vector<1x8x32xf32>,
    %29 = vector.extract_strided_slice %10 {offsets = [2, 0, 0], sizes = [1, 8, 32], strides = [1, 1, 1]} : vector<8x8x32xf32> to vector<1x8x32xf32>
    %30 = vector.shape_cast %29 : vector<1x8x32xf32> to vector<8x32xf32>
    %cst_17 = arith.constant dense<0.000000e+00> : vector<8x32xf32>
    %31 = tpu.matmul %25, %1, %cst_17 {dimension_numbers = #tpu.dot_dimension_numbers<[1], [0], [0], [1], [0, 0, 1, 1], [], []>} : vector<8x32xf32>, vector<32x32xf32>, vector<8x32xf32> -> vector<8x32xf32>
    %32 = arith.addf %30, %31 : vector<8x32xf32>
    %33 = math.tanh %32 : vector<8x32xf32>
    %c2 = arith.constant 2 : index
    %c0_18 = arith.constant 0 : index
    %c0_19 = arith.constant 0 : index
    %34 = vector.load %arg13[%c2, %c0_18, %c0_19] : memref<8x8x32xf32, #tpu.memory_space<vmem>>, vector<1x8x32xf32>
    %35 = vector.shape_cast %34 : vector<1x8x32xf32> to vector<8x32xf32>
    %36 = vector.shape_cast %33 : vector<8x32xf32> to vector<1x8x32xf32>
    tpu.vector_store %arg13[%c2, %c0_18, %c0_19], %36 {strides = array<i32>} : memref<8x8x32xf32, #tpu.memory_space<vmem>>, vector<1x8x32xf32>,
    %37 = vector.extract_strided_slice %10 {offsets = [3, 0, 0], sizes = [1, 8, 32], strides = [1, 1, 1]} : vector<8x8x32xf32> to vector<1x8x32xf32>
    %38 = vector.shape_cast %37 : vector<1x8x32xf32> to vector<8x32xf32>
    %cst_20 = arith.constant dense<0.000000e+00> : vector<8x32xf32>
    %39 = tpu.matmul %33, %1, %cst_20 {dimension_numbers = #tpu.dot_dimension_numbers<[1], [0], [0], [1], [0, 0, 1, 1], [], []>} : vector<8x32xf32>, vector<32x32xf32>, vector<8x32xf32> -> vector<8x32xf32>
    %40 = arith.addf %38, %39 : vector<8x32xf32>
    %41 = math.tanh %40 : vector<8x32xf32>
    %c3 = arith.constant 3 : index
    %c0_21 = arith.constant 0 : index
    %c0_22 = arith.constant 0 : index
    %42 = vector.load %arg13[%c3, %c0_21, %c0_22] : memref<8x8x32xf32, #tpu.memory_space<vmem>>, vector<1x8x32xf32>
    %43 = vector.shape_cast %42 : vector<1x8x32xf32> to vector<8x32xf32>
    %44 = vector.shape_cast %41 : vector<8x32xf32> to vector<1x8x32xf32>
    tpu.vector_store %arg13[%c3, %c0_21, %c0_22], %44 {strides = array<i32>} : memref<8x8x32xf32, #tpu.memory_space<vmem>>, vector<1x8x32xf32>,
    %45 = vector.extract_strided_slice %10 {offsets = [4, 0, 0], sizes = [1, 8, 32], strides = [1, 1, 1]} : vector<8x8x32xf32> to vector<1x8x32xf32>
    %46 = vector.shape_cast %45 : vector<1x8x32xf32> to vector<8x32xf32>
    %cst_23 = arith.constant dense<0.000000e+00> : vector<8x32xf32>
    %47 = tpu.matmul %41, %1, %cst_23 {dimension_numbers = #tpu.dot_dimension_numbers<[1], [0], [0], [1], [0, 0, 1, 1], [], []>} : vector<8x32xf32>, vector<32x32xf32>, vector<8x32xf32> -> vector<8x32xf32>
    %48 = arith.addf %46, %47 : vector<8x32xf32>
    %49 = math.tanh %48 : vector<8x32xf32>
    %c4 = arith.constant 4 : index
    %c0_24 = arith.constant 0 : index
    %c0_25 = arith.constant 0 : index
    %50 = vector.load %arg13[%c4, %c0_24, %c0_25] : memref<8x8x32xf32, #tpu.memory_space<vmem>>, vector<1x8x32xf32>
    %51 = vector.shape_cast %50 : vector<1x8x32xf32> to vector<8x32xf32>
    %52 = vector.shape_cast %49 : vector<8x32xf32> to vector<1x8x32xf32>
    tpu.vector_store %arg13[%c4, %c0_24, %c0_25], %52 {strides = array<i32>} : memref<8x8x32xf32, #tpu.memory_space<vmem>>, vector<1x8x32xf32>,
    %53 = vector.extract_strided_slice %10 {offsets = [5, 0, 0], sizes = [1, 8, 32], strides = [1, 1, 1]} : vector<8x8x32xf32> to vector<1x8x32xf32>
    %54 = vector.shape_cast %53 : vector<1x8x32xf32> to vector<8x32xf32>
    %cst_26 = arith.constant dense<0.000000e+00> : vector<8x32xf32>
    %55 = tpu.matmul %49, %1, %cst_26 {dimension_numbers = #tpu.dot_dimension_numbers<[1], [0], [0], [1], [0, 0, 1, 1], [], []>} : vector<8x32xf32>, vector<32x32xf32>, vector<8x32xf32> -> vector<8x32xf32>
    %56 = arith.addf %54, %55 : vector<8x32xf32>
    %57 = math.tanh %56 : vector<8x32xf32>
    %c5 = arith.constant 5 : index
    %c0_27 = arith.constant 0 : index
    %c0_28 = arith.constant 0 : index
    %58 = vector.load %arg13[%c5, %c0_27, %c0_28] : memref<8x8x32xf32, #tpu.memory_space<vmem>>, vector<1x8x32xf32>
    %59 = vector.shape_cast %58 : vector<1x8x32xf32> to vector<8x32xf32>
    %60 = vector.shape_cast %57 : vector<8x32xf32> to vector<1x8x32xf32>
    tpu.vector_store %arg13[%c5, %c0_27, %c0_28], %60 {strides = array<i32>} : memref<8x8x32xf32, #tpu.memory_space<vmem>>, vector<1x8x32xf32>,
    %61 = vector.extract_strided_slice %10 {offsets = [6, 0, 0], sizes = [1, 8, 32], strides = [1, 1, 1]} : vector<8x8x32xf32> to vector<1x8x32xf32>
    %62 = vector.shape_cast %61 : vector<1x8x32xf32> to vector<8x32xf32>
    %cst_29 = arith.constant dense<0.000000e+00> : vector<8x32xf32>
    %63 = tpu.matmul %57, %1, %cst_29 {dimension_numbers = #tpu.dot_dimension_numbers<[1], [0], [0], [1], [0, 0, 1, 1], [], []>} : vector<8x32xf32>, vector<32x32xf32>, vector<8x32xf32> -> vector<8x32xf32>
    %64 = arith.addf %62, %63 : vector<8x32xf32>
    %65 = math.tanh %64 : vector<8x32xf32>
    %c6 = arith.constant 6 : index
    %c0_30 = arith.constant 0 : index
    %c0_31 = arith.constant 0 : index
    %66 = vector.load %arg13[%c6, %c0_30, %c0_31] : memref<8x8x32xf32, #tpu.memory_space<vmem>>, vector<1x8x32xf32>
    %67 = vector.shape_cast %66 : vector<1x8x32xf32> to vector<8x32xf32>
    %68 = vector.shape_cast %65 : vector<8x32xf32> to vector<1x8x32xf32>
    tpu.vector_store %arg13[%c6, %c0_30, %c0_31], %68 {strides = array<i32>} : memref<8x8x32xf32, #tpu.memory_space<vmem>>, vector<1x8x32xf32>,
    %69 = vector.extract_strided_slice %10 {offsets = [7, 0, 0], sizes = [1, 8, 32], strides = [1, 1, 1]} : vector<8x8x32xf32> to vector<1x8x32xf32>
    %70 = vector.shape_cast %69 : vector<1x8x32xf32> to vector<8x32xf32>
    %cst_32 = arith.constant dense<0.000000e+00> : vector<8x32xf32>
    %71 = tpu.matmul %65, %1, %cst_32 {dimension_numbers = #tpu.dot_dimension_numbers<[1], [0], [0], [1], [0, 0, 1, 1], [], []>} : vector<8x32xf32>, vector<32x32xf32>, vector<8x32xf32> -> vector<8x32xf32>
    %72 = arith.addf %70, %71 : vector<8x32xf32>
    %73 = math.tanh %72 : vector<8x32xf32>
    %c7 = arith.constant 7 : index
    %c0_33 = arith.constant 0 : index
    %c0_34 = arith.constant 0 : index
    %74 = vector.load %arg13[%c7, %c0_33, %c0_34] : memref<8x8x32xf32, #tpu.memory_space<vmem>>, vector<1x8x32xf32>
    %75 = vector.shape_cast %74 : vector<1x8x32xf32> to vector<8x32xf32>
    %76 = vector.shape_cast %73 : vector<8x32xf32> to vector<1x8x32xf32>
    tpu.vector_store %arg13[%c7, %c0_33, %c0_34], %76 {strides = array<i32>} : memref<8x8x32xf32, #tpu.memory_space<vmem>>, vector<1x8x32xf32>,
    %c0_35 = arith.constant 0 : index
    %c0_36 = arith.constant 0 : index
    %77 = vector.load %arg6[%c0_35, %c0_36] : memref<32x32xf32, #tpu.memory_space<vmem>>, vector<32x32xf32>
    %c0_37 = arith.constant 0 : index
    %c0_38 = arith.constant 0 : index
    %78 = vector.load %arg7[%c0_37, %c0_38] : memref<32x32xf32, #tpu.memory_space<vmem>>, vector<32x32xf32>
    %c0_39 = arith.constant 0 : index
    %c0_40 = arith.constant 0 : index
    %79 = vector.load %arg8[%c0_39, %c0_40] : memref<1x32xf32, #tpu.memory_space<vmem>>, vector<1x32xf32>
    %c0_41 = arith.constant 0 : index
    %c0_42 = arith.constant 0 : index
    %80 = vector.load %arg9[%c0_41, %c0_42] : memref<1x32xf32, #tpu.memory_space<vmem>>, vector<1x32xf32>
    %c0_43 = arith.constant 0 : index
    %c0_44 = arith.constant 0 : index
    %c0_45 = arith.constant 0 : index
    %81 = vector.load %arg13[%c0_43, %c0_44, %c0_45] : memref<8x8x32xf32, #tpu.memory_space<vmem>>, vector<8x8x32xf32>
    %82 = vector.shape_cast %81 : vector<8x8x32xf32> to vector<64x32xf32>
    %cst_46 = arith.constant dense<0.000000e+00> : vector<64x32xf32>
    %83 = tpu.matmul %82, %77, %cst_46 {dimension_numbers = #tpu.dot_dimension_numbers<[1], [0], [0], [1], [0, 0, 1, 1], [], []>} : vector<64x32xf32>, vector<32x32xf32>, vector<64x32xf32> -> vector<64x32xf32>
    %84 = vector.broadcast %79 : vector<1x32xf32> to vector<64x32xf32>
    %85 = arith.addf %83, %84 : vector<64x32xf32>
    %86 = vector.shape_cast %85 : vector<64x32xf32> to vector<8x8x32xf32>
    %87 = vector.shape_cast %80 : vector<1x32xf32> to vector<1x32xf32>
    %88 = vector.broadcast %87 : vector<1x32xf32> to vector<8x32xf32>
    %89 = vector.extract_strided_slice %86 {offsets = [0, 0, 0], sizes = [1, 8, 32], strides = [1, 1, 1]} : vector<8x8x32xf32> to vector<1x8x32xf32>
    %90 = vector.shape_cast %89 : vector<1x8x32xf32> to vector<8x32xf32>
    %cst_47 = arith.constant dense<0.000000e+00> : vector<8x32xf32>
    %91 = tpu.matmul %88, %78, %cst_47 {dimension_numbers = #tpu.dot_dimension_numbers<[1], [0], [0], [1], [0, 0, 1, 1], [], []>} : vector<8x32xf32>, vector<32x32xf32>, vector<8x32xf32> -> vector<8x32xf32>
    %92 = arith.addf %90, %91 : vector<8x32xf32>
    %93 = math.tanh %92 : vector<8x32xf32>
    %94 = vector.extract_strided_slice %86 {offsets = [1, 0, 0], sizes = [1, 8, 32], strides = [1, 1, 1]} : vector<8x8x32xf32> to vector<1x8x32xf32>
    %95 = vector.shape_cast %94 : vector<1x8x32xf32> to vector<8x32xf32>
    %cst_48 = arith.constant dense<0.000000e+00> : vector<8x32xf32>
    %96 = tpu.matmul %93, %78, %cst_48 {dimension_numbers = #tpu.dot_dimension_numbers<[1], [0], [0], [1], [0, 0, 1, 1], [], []>} : vector<8x32xf32>, vector<32x32xf32>, vector<8x32xf32> -> vector<8x32xf32>
    %97 = arith.addf %95, %96 : vector<8x32xf32>
    %98 = math.tanh %97 : vector<8x32xf32>
    %99 = vector.extract_strided_slice %86 {offsets = [2, 0, 0], sizes = [1, 8, 32], strides = [1, 1, 1]} : vector<8x8x32xf32> to vector<1x8x32xf32>
    %100 = vector.shape_cast %99 : vector<1x8x32xf32> to vector<8x32xf32>
    %cst_49 = arith.constant dense<0.000000e+00> : vector<8x32xf32>
    %101 = tpu.matmul %98, %78, %cst_49 {dimension_numbers = #tpu.dot_dimension_numbers<[1], [0], [0], [1], [0, 0, 1, 1], [], []>} : vector<8x32xf32>, vector<32x32xf32>, vector<8x32xf32> -> vector<8x32xf32>
    %102 = arith.addf %100, %101 : vector<8x32xf32>
    %103 = math.tanh %102 : vector<8x32xf32>
    %104 = vector.extract_strided_slice %86 {offsets = [3, 0, 0], sizes = [1, 8, 32], strides = [1, 1, 1]} : vector<8x8x32xf32> to vector<1x8x32xf32>
    %105 = vector.shape_cast %104 : vector<1x8x32xf32> to vector<8x32xf32>
    %cst_50 = arith.constant dense<0.000000e+00> : vector<8x32xf32>
    %106 = tpu.matmul %103, %78, %cst_50 {dimension_numbers = #tpu.dot_dimension_numbers<[1], [0], [0], [1], [0, 0, 1, 1], [], []>} : vector<8x32xf32>, vector<32x32xf32>, vector<8x32xf32> -> vector<8x32xf32>
    %107 = arith.addf %105, %106 : vector<8x32xf32>
    %108 = math.tanh %107 : vector<8x32xf32>
    %109 = vector.extract_strided_slice %86 {offsets = [4, 0, 0], sizes = [1, 8, 32], strides = [1, 1, 1]} : vector<8x8x32xf32> to vector<1x8x32xf32>
    %110 = vector.shape_cast %109 : vector<1x8x32xf32> to vector<8x32xf32>
    %cst_51 = arith.constant dense<0.000000e+00> : vector<8x32xf32>
    %111 = tpu.matmul %108, %78, %cst_51 {dimension_numbers = #tpu.dot_dimension_numbers<[1], [0], [0], [1], [0, 0, 1, 1], [], []>} : vector<8x32xf32>, vector<32x32xf32>, vector<8x32xf32> -> vector<8x32xf32>
    %112 = arith.addf %110, %111 : vector<8x32xf32>
    %113 = math.tanh %112 : vector<8x32xf32>
    %114 = vector.extract_strided_slice %86 {offsets = [5, 0, 0], sizes = [1, 8, 32], strides = [1, 1, 1]} : vector<8x8x32xf32> to vector<1x8x32xf32>
    %115 = vector.shape_cast %114 : vector<1x8x32xf32> to vector<8x32xf32>
    %cst_52 = arith.constant dense<0.000000e+00> : vector<8x32xf32>
    %116 = tpu.matmul %113, %78, %cst_52 {dimension_numbers = #tpu.dot_dimension_numbers<[1], [0], [0], [1], [0, 0, 1, 1], [], []>} : vector<8x32xf32>, vector<32x32xf32>, vector<8x32xf32> -> vector<8x32xf32>
    %117 = arith.addf %115, %116 : vector<8x32xf32>
    %118 = math.tanh %117 : vector<8x32xf32>
    %119 = vector.extract_strided_slice %86 {offsets = [6, 0, 0], sizes = [1, 8, 32], strides = [1, 1, 1]} : vector<8x8x32xf32> to vector<1x8x32xf32>
    %120 = vector.shape_cast %119 : vector<1x8x32xf32> to vector<8x32xf32>
    %cst_53 = arith.constant dense<0.000000e+00> : vector<8x32xf32>
    %121 = tpu.matmul %118, %78, %cst_53 {dimension_numbers = #tpu.dot_dimension_numbers<[1], [0], [0], [1], [0, 0, 1, 1], [], []>} : vector<8x32xf32>, vector<32x32xf32>, vector<8x32xf32> -> vector<8x32xf32>
    %122 = arith.addf %120, %121 : vector<8x32xf32>
    %123 = math.tanh %122 : vector<8x32xf32>
    %124 = vector.extract_strided_slice %86 {offsets = [7, 0, 0], sizes = [1, 8, 32], strides = [1, 1, 1]} : vector<8x8x32xf32> to vector<1x8x32xf32>
    %125 = vector.shape_cast %124 : vector<1x8x32xf32> to vector<8x32xf32>
    %cst_54 = arith.constant dense<0.000000e+00> : vector<8x32xf32>
    %126 = tpu.matmul %123, %78, %cst_54 {dimension_numbers = #tpu.dot_dimension_numbers<[1], [0], [0], [1], [0, 0, 1, 1], [], []>} : vector<8x32xf32>, vector<32x32xf32>, vector<8x32xf32> -> vector<8x32xf32>
    %127 = arith.addf %125, %126 : vector<8x32xf32>
    %128 = math.tanh %127 : vector<8x32xf32>
    %c0_55 = arith.constant 0 : index
    %c0_56 = arith.constant 0 : index
    %129 = vector.load %arg10[%c0_55, %c0_56] : memref<32x8xf32, #tpu.memory_space<vmem>>, vector<32x8xf32>
    %cst_57 = arith.constant dense<0.000000e+00> : vector<8x8xf32>
    %130 = tpu.matmul %128, %129, %cst_57 {dimension_numbers = #tpu.dot_dimension_numbers<[1], [0], [0], [1], [0, 0, 1, 1], [], []>} : vector<8x32xf32>, vector<32x8xf32>, vector<8x8xf32> -> vector<8x8xf32>
    %c0_58 = arith.constant 0 : index
    %c0_59 = arith.constant 0 : index
    %131 = vector.load %arg11[%c0_58, %c0_59] : memref<1x8xf32, #tpu.memory_space<vmem>>, vector<1x8xf32>
    %132 = vector.broadcast %131 : vector<1x8xf32> to vector<8x8xf32>
    %133 = arith.addf %130, %132 : vector<8x8xf32>
    %c0_60 = arith.constant 0 : index
    %c0_61 = arith.constant 0 : index
    %134 = vector.load %arg12[%c0_60, %c0_61] : memref<8x8xf32, #tpu.memory_space<vmem>>, vector<8x8xf32>
    tpu.vector_store %arg12[%c0_60, %c0_61], %133 {strides = array<i32>} : memref<8x8xf32, #tpu.memory_space<vmem>>, vector<8x8xf32>,
    return
  }
  func.func @transform_0(%arg0: i32) -> (i32, i32, i32) {
    %c0_i32 = arith.constant 0 : i32
    %c0_i32_0 = arith.constant 0 : i32
    %c0_i32_1 = arith.constant 0 : i32
    return %arg0, %c0_i32, %c0_i32_0 : i32, i32, i32
  }
  func.func @transform_1(%arg0: i32) -> (i32, i32) {
    %c0_i32 = arith.constant 0 : i32
    %c0_i32_0 = arith.constant 0 : i32
    %c0_i32_1 = arith.constant 0 : i32
    return %c0_i32, %c0_i32_0 : i32, i32
  }
  func.func @transform_2(%arg0: i32) -> (i32, i32) {
    %c0_i32 = arith.constant 0 : i32
    %c0_i32_0 = arith.constant 0 : i32
    %c0_i32_1 = arith.constant 0 : i32
    return %c0_i32, %c0_i32_0 : i32, i32
  }
  func.func @transform_3(%arg0: i32) -> (i32, i32) {
    %c0_i32 = arith.constant 0 : i32
    %c0_i32_0 = arith.constant 0 : i32
    %c0_i32_1 = arith.constant 0 : i32
    return %c0_i32, %c0_i32_0 : i32, i32
  }
  func.func @transform_4(%arg0: i32) -> (i32, i32) {
    %c0_i32 = arith.constant 0 : i32
    %c0_i32_0 = arith.constant 0 : i32
    %c0_i32_1 = arith.constant 0 : i32
    return %c0_i32, %c0_i32_0 : i32, i32
  }
  func.func @transform_5(%arg0: i32) -> (i32, i32) {
    %c0_i32 = arith.constant 0 : i32
    %c0_i32_0 = arith.constant 0 : i32
    %c0_i32_1 = arith.constant 0 : i32
    return %c0_i32, %c0_i32_0 : i32, i32
  }
  func.func @transform_6(%arg0: i32) -> (i32, i32) {
    %c0_i32 = arith.constant 0 : i32
    %c0_i32_0 = arith.constant 0 : i32
    %c0_i32_1 = arith.constant 0 : i32
    return %c0_i32, %c0_i32_0 : i32, i32
  }
  func.func @transform_7(%arg0: i32) -> (i32, i32) {
    %c0_i32 = arith.constant 0 : i32
    %c0_i32_0 = arith.constant 0 : i32
    %c0_i32_1 = arith.constant 0 : i32
    return %c0_i32, %c0_i32_0 : i32, i32
  }
  func.func @transform_8(%arg0: i32) -> (i32, i32) {
    %c0_i32 = arith.constant 0 : i32
    %c0_i32_0 = arith.constant 0 : i32
    %c0_i32_1 = arith.constant 0 : i32
    return %c0_i32, %c0_i32_0 : i32, i32
  }
  func.func @transform_9(%arg0: i32) -> (i32, i32) {
    %c0_i32 = arith.constant 0 : i32
    %c0_i32_0 = arith.constant 0 : i32
    %c0_i32_1 = arith.constant 0 : i32
    return %c0_i32, %c0_i32_0 : i32, i32
  }
  func.func @transform_10(%arg0: i32) -> (i32, i32) {
    %c0_i32 = arith.constant 0 : i32
    %c0_i32_0 = arith.constant 0 : i32
    %c0_i32_1 = arith.constant 0 : i32
    return %c0_i32, %c0_i32_0 : i32, i32
  }
  func.func @transform_11(%arg0: i32) -> (i32, i32) {
    %c0_i32 = arith.constant 0 : i32
    %c0_i32_0 = arith.constant 0 : i32
    return %arg0, %c0_i32 : i32, i32
  }
}

</mosaic_0001>

<bundles_post_ra>
// kernel: rnn_model_forward.1
= control target key start
LH: loop header
LB: loop body
LE: loop exit
PB: predicated region body
PF: predicated region fallthrough
CT: control target
= control target key end

     0   :  { %s3605_s0 = inlined_call_operand.hbm [shape: f32[16,8,16], index: 0, kind: input, shape index: {}]   ;;  %s3606_s1 = inlined_call_operand.hbm [shape: f32[16,32], index: 1, kind: input, shape index: {}]   ;;  %s3607_s2 = inlined_call_operand.vmem [shape: f32[32,32], index: 2, kind: input, shape index: {}]   ;;  %s3608_s3 = inlined_call_operand.vmem [shape: f32[1,32], index: 3, kind: input, shape index: {}]   ;;  %s3609_s4 = inlined_call_operand.vmem [shape: f32[1,32], index: 4, kind: input, shape index: {}]   ;;  %s3610_s5 = inlined_call_operand.hbm [shape: f32[32,32], index: 5, kind: input, shape index: {}]   ;;  %s3611_s6 = inlined_call_operand.vmem [shape: f32[32,32], index: 6, kind: input, shape index: {}]   ;;  %s3612_s7 = inlined_call_operand.vmem [shape: f32[1,32], index: 7, kind: input, shape index: {}]   ;;  %s3613_s8 = inlined_call_operand.vmem [shape: f32[1,32], index: 8, kind: input, shape index: {}]   ;;  %s3614_s9 = inlined_call_operand.vmem [shape: f32[32,8], index: 9, kind: input, shape index: {}]   ;;  %s3615_s10 = inlined_call_operand.hbm [shape: f32[1,8], index: 10, kind: input, shape index: {}]   ;;  %s3616_s11 = inlined_call_operand.vmem [shape: f32[16,8], index: 11, kind: output, shape index: {}]  }
   0x1   :  { %3621 = sst [smem:[#allocation13_spill]] %s3612_s7 }
   0x2   :  { %3622 = sst [smem:[#allocation14_spill]] %s3614_s9 }
   0x3   :  { %3623 = sst [smem:[#allocation15_spill]] %s3616_s11 }
   0x4   :  { %16 = vsyncpa [#allocation4], 0 }
   0x5   :  { %18 = vsyncpa [#allocation4 + $0x1], 0 }
   0x6   :  { %19 = vsyncpa [#allocation6], 0 }
   0x7   :  { %20 = vsyncpa [#allocation9], 0  ;;  %s3131_s17 = smov 0   ;;  %s3133_s18 = smov 0  }
   0x8   :  { %s3135_s19 = smov 0   ;;  %s3137_s20 = smov 0  }
   0x9 LB: > { %s3150_s21 = sadd.s32 4294967295, %s3058_s20   ;;  %p46_p0 = scmp.ne.s32.totalorder %s3050_s18, %s3046_s17  ;;  %s3058_s20 = sphi %s3137_s20, %s3642_s20   ;;  %s3054_s19 = sphi %s3135_s19, %s3641_s19   ;;  %s3050_s18 = sphi %s3133_s18, %s3640_s18   ;;  %s3046_s17 = sphi %s3131_s17, %s3639_s17  }
   0xa   : > { %p3617_p1 = scmp.eq.s32.totalorder %s3150_s21, 0  ;;  %p2294_p2 = scmp.ge.s32.totalorder %s3058_s20, 1 }
   0xb   : > { %p293_p3 = scmp.lt.s32.totalorder %s3058_s20, 3  ;;  %s3060_s24 = smov [#allocation5]  }
   0xc   : > { %p3158_p4 = por %p3617_p1, %p46_p0  ;;  %s305_s25 = sshll.u32 %s3060_s24, 4  ;;  %s3166_s25 = int_to_ptr.vmem [resolvable:$true] %s305_s25 }
   0xd   : > { %p3162_p5 = pnand %p2294_p2, %p293_p3  ;;  %s3061_s27 = smov [#allocation7]  }
   0xe   : > { %s3624_s22 = scalar_select %p3158_p4, 1, 0 }
   0xf   : > { %s3625_s23 = scalar_select %p3162_p5, 1, 0 }
  0x10   : > { %p2807_p6 = pneg %p3162_p5  ;;  %s327_s28 = sshll.u32 %s3061_s27, 4  ;;  %s3176_s28 = int_to_ptr.vmem [resolvable:$true] %s327_s28 }
  0x11   : > { %s3062_s29 = smov [#allocation8]   ;;  %s2902_s14 = scalar_lea.hbm %s3606_s1, 256 }
  0x12   : > { %p3172_p7 = pnand %p2807_p6, %p3617_p1  ;;  %s3178_s30 = sshll.u32 %s3062_s29, 4  ;;  %s354_s30 = int_to_ptr.vmem [resolvable:$true] %s3178_s30 }
  0x13   : > { %p2903_p8 = scmp.ne.s32.totalorder %s3606_s1, %s2902_s14  ;;  %p2909_p12 = scmp.lt.u32.totalorder %s2902_s14, %s3606_s1 }
  0x14   : > { %p3188_p9 = pneg %p3172_p7 }
  0x16   : > { %p2905_p10 = pnand %p3188_p9, %p2903_p8 }
  0x18   : > { %p2906_p11 = pneg %p2905_p10 }
  0x1a   : > { %p2911_p13 = pnand %p2909_p12, %p2906_p11 }
  0x1c   : > { %2914 = shalt.err (!%p2911_p13)
}
  0x1d   : > { %s2915_s29 = scalar_lea.vmem %s3166_s25, 256  ;;  %p2923_p6 = scmp.lt.s32.totalorder %s3166_s25, %s3166_s25 }
  0x1e   : > { %p2916_p0 = scmp.ne.s32.totalorder %s3166_s25, %s2915_s29  ;;  %p2924_p1 = scmp.lt.s32.totalorder %s2915_s29, %s2915_s29 }
  0x20   : > { %p2918_p2 = pnand %p2916_p0, %p3188_p9  ;;  %p2925_p8 = por %p2924_p1, %p2923_p6 }
  0x22   : > { %p2919_p3 = pneg %p2918_p2 }
  0x24   : > { %p2926_p10 = pnand %p2925_p8, %p2919_p3 }
  0x26   : > { %2929 = shalt.err (!%p2926_p10)
}
  0x27   : > { %s3063_s12 = smov 128   ;;  %s3064_s13 = smov 8  }
  0x28   : > { %2810 = dma.hbm_to_vmem [thread:$0]  (!%p3172_p7), %s3606_s1, 256, %s3166_s25, [#allocation6], %s3063_s12, %s3063_s12, %s3064_s13  }
  0x29   : > { %s2930_s27 = scalar_lea.hbm %s3610_s5, 512 }
  0x2a   : > { %p2931_p1 = scmp.ne.s32.totalorder %s3610_s5, %s2930_s27  ;;  %p2937_p13 = scmp.lt.u32.totalorder %s2930_s27, %s3610_s5 }
  0x2c   : > { %p2933_p11 = pnand %p2931_p1, %p3188_p9 }
  0x2e   : > { %p2934_p12 = pneg %p2933_p11 }
  0x30   : > { %p2939_p0 = pnand %p2937_p13, %p2934_p12 }
  0x32   : > { %2942 = shalt.err (!%p2939_p0)
}
  0x33   : > { %s2943_s25 = scalar_lea.vmem %s3176_s28, 512  ;;  %p2951_p8 = scmp.lt.s32.totalorder %s3176_s28, %s3176_s28 }
  0x34   : > { %p2944_p2 = scmp.ne.s32.totalorder %s3176_s28, %s2943_s25  ;;  %p2952_p10 = scmp.lt.s32.totalorder %s2943_s25, %s2943_s25 }
  0x36   : > { %p2946_p3 = pnand %p2944_p2, %p3188_p9  ;;  %p2953_p1 = por %p2952_p10, %p2951_p8 }
  0x38   : > { %p2947_p6 = pneg %p2946_p3 }
  0x3a   : > { %p2954_p11 = pnand %p2953_p1, %p2947_p6 }
  0x3c   : > { %2957 = shalt.err (!%p2954_p11)
}
  0x3d   : > { %2813 = dma.hbm_to_vmem [thread:$0]  (!%p3172_p7), %s3610_s5, 512, %s3176_s28, [#allocation6], %s3063_s12, %s3063_s12, %s3064_s13  }
  0x3e   : > { %s2958_s15 = scalar_lea.hbm %s3615_s10, 16 }
  0x3f   : > { %p2959_p12 = scmp.ne.s32.totalorder %s3615_s10, %s2958_s15  ;;  %p2965_p2 = scmp.lt.u32.totalorder %s2958_s15, %s3615_s10 }
  0x41   : > { %p2961_p13 = pnand %p2959_p12, %p3188_p9 }
  0x43   : > { %p2962_p0 = pneg %p2961_p13 }
  0x45   : > { %p2967_p3 = pnand %p2965_p2, %p2962_p0 }
  0x47   : > { %2970 = shalt.err (!%p2967_p3)
}
  0x48   : > { %s2971_s25 = scalar_lea.vmem %s354_s30, 16  ;;  %s2978_s28 = scalar_lea.vmem %s354_s30, 32 }
  0x49   : > { %p2972_p6 = scmp.ne.s32.totalorder %s354_s30, %s2971_s25  ;;  %p2979_p1 = scmp.lt.s32.totalorder %s354_s30, %s354_s30 }
  0x4a   : > { %p2980_p11 = scmp.lt.s32.totalorder %s2978_s28, %s2971_s25 }
  0x4b   : > { %p2974_p8 = pnand %p2972_p6, %p3188_p9 }
  0x4c   : > { %p2981_p4 = por %p2980_p11, %p2979_p1 }
  0x4d   : > { %p2975_p10 = pneg %p2974_p8 }
  0x4f   : > { %p2982_p5 = pnand %p2981_p4, %p2975_p10 }
  0x51   : > { %2985 = shalt.err (!%p2982_p5)
}
  0x52   : > { %2816 = dma.hbm_to_vmem [thread:$0]  (!%p3172_p7), %s3615_s10, 16, %s354_s30, [#allocation9]  }
  0x53   : > { %s3258_s17 = sadd.s32 1, %s3058_s20   ;;  %s33_s14 = sadd.s32 1, %s3054_s19 }
  0x54   : > { %s30_s11 = ssub.s32 %s3058_s20, %s3258_s17  ;;  %p40_p5 = scmp.ne.s32.totalorder %s3054_s19, %s3050_s18 }
  0x55   : > { %p31_p4 = scmp.eq.s32.totalorder %s30_s11, 0  ;;  %p41_p9 = scmp.eq.s32.totalorder %s3058_s20, 0 }
  0x56   : > { %p2824_p12 = scmp.lt.s32.totalorder %s3058_s20, 2  ;;  %s364_s15 = sand.u32 1, %s3054_s19  }
  0x57   : > { %s3268_s26 = scalar_select %p31_p4, %s3054_s19, %s33_s14  }
  0x58   : > { %p42_p13 = por %p41_p9, %p40_p5  ;;  %s2299_s16 = sshll.u32 %s364_s15, 6 }
  0x59   : > { %s2348_s24 = sshll.u32 %s3058_s20, 10  ;;  %s368_s30 = scalar_lea.vmem [#allocation3], %s2299_s16 }
  0x5a   : > { %s3275_s25 = scalar_lea.hbm %s3605_s0, %s2348_s24  ;;  %s375_s28 = sshll.u32 %s368_s30, 4  ;;  %s3277_s28 = int_to_ptr.vmem [resolvable:$true] %s375_s28 }
  0x5b   : > { %p3279_p7 = pnand %p2824_p12, %p42_p13  ;;  %s3283_s20 = scalar_lea.sflag [#allocation4], %s364_s15 }
  0x5c   : > { %s2986_s9 = scalar_lea.hbm %s3275_s25, 1024  ;;  %s2991_s16 = scalar_lea.hbm %s3605_s0, 2048 }
  0x5d   : > { %p2987_p0 = scmp.ne.s32.totalorder %s3275_s25, %s2986_s9  ;;  %p2988_p2 = pneg %p3279_p7 }
  0x5e   : > { %p2992_p8 = scmp.lt.u32.totalorder %s3275_s25, %s3605_s0  ;;  %p2993_p10 = scmp.lt.u32.totalorder %s2991_s16, %s2986_s9 }
  0x5f   : > { %p2989_p3 = pnand %p2988_p2, %p2987_p0  ;;  %p2995_p11 = scmp.lt.u32.totalorder %s2986_s9, %s3275_s25 }
  0x60   : > { %p2994_p1 = por %p2993_p10, %p2992_p8 }
  0x61   : > { %p2990_p6 = pneg %p2989_p3 }
  0x62   : > { %p2996_p4 = por %p2995_p11, %p2994_p1 }
  0x64   : > { %p2997_p5 = pnand %p2996_p4, %p2990_p6 }
  0x66   : > { %3000 = shalt.err (!%p2997_p5)
}
  0x67   : > { %s3001_s15 = scalar_lea.vmem %s3277_s28, 1024  ;;  %s3065_s29 = smov [#allocation3]  }
  0x68   : > { %p3002_p9 = scmp.ne.s32.totalorder %s3277_s28, %s3001_s15  ;;  %s3006_s30 = sshll.u32 %s3065_s29, 4  ;;  %s3007_s30 = int_to_ptr.vmem [resolvable:$false] %s3006_s30 }
  0x69   : > { %s3008_s11 = scalar_lea.vmem %s3007_s30, 2048  ;;  %p3009_p0 = scmp.lt.s32.totalorder %s3277_s28, %s3007_s30 }
  0x6a   : > { %p3004_p12 = pnand %p3002_p9, %p2988_p2  ;;  %p3010_p3 = scmp.lt.s32.totalorder %s3008_s11, %s3001_s15 }
  0x6c   : > { %p3005_p13 = pneg %p3004_p12  ;;  %p3011_p8 = por %p3010_p3, %p3009_p0 }
  0x6e   : > { %p3012_p10 = pnand %p3011_p8, %p3005_p13 }
  0x70   : > { %3015 = shalt.err (!%p3012_p10)
}
  0x71   : > { %2820 = dma.hbm_to_vmem [thread:$0]  (!%p3279_p7), %s3275_s25, 1024, %s3277_s28, %s3283_s20, %s3063_s12, %s3063_s12, %s3064_s13  }
  0x72   : > { %p3629_p2 = scmp.ne.s32.totalorder %s3625_s23, 0 }
  0x73   : > { %s389_s9 = sand.u32 (!%p3629_p2), 1, %s3050_s18   ;;  %p3630_p6 = scmp.ne.s32.totalorder (!%p3629_p2), %s3624_s22, 0 }
  0x74   : > { %387 = sbr.rel (%p3629_p2) target bundleno = 3760 (0xeb0), region = 64  ;;  %s2303_s14 = sshll.u32 (!%p3629_p2), %s389_s9, 6 }
  0x75   : > { %s390_s16 = scalar_lea.sflag (!%p3629_p2), [#allocation4], %s389_s9  ;;  %s3317_s24 = scalar_lea.vmem (!%p3629_p2), [#allocation3], %s2303_s14 }
  0x7b   : > { %3033 = dma.done.wait (%p3630_p6), %s390_s16, 1024  }
  0x7c   : > { %3035 = vsyncadd (%p3630_p6), %s390_s16, 4294966272  ;;  %p3631_p1 = scmp.eq.s32.totalorder %s3150_s21, 0 }
  0x7e   : > { %3037 = dma.done.wait (%p3631_p1), [#allocation6], 768   ;;  %p3632_p7 = pmov %p3631_p1 }
  0x7f   : > { %p3633_p11 = pmov %p3631_p1 }
  0x80   : > { %3039 = vsyncadd (%p3632_p7), [#allocation6], 4294966528 }
  0x81   : > { %3041 = dma.done.wait (%p3633_p11), [#allocation9], 16   ;;  %p3634_p4 = pmov %p3631_p1 }
  0x82   : > { %v3066_v0 = vmov 0.0|0.0   ;;  %vm3067_vm0 = vmmov 0   ;;  %v3068_v1 = vmov 0.0   ;;  %vm470_vm1 = vcmask 130048   ;;  %v448_v2 = vld [vmem:[#allocation5] sm:$0xff]  ;;  %v449_v3 = vld [vmem:[#allocation5 + $0x8] sm:$0xff] }
  0x83   : > { %3043 = vsyncadd (%p3634_p4), [#allocation9], 4294967280  ;;  %2683 = vmatprep.subr.bf16.mxu1 %v3066_v0  ;;  %2480 = vmatprep.mubr.msk.f32.mxu1 %vm3067_vm0, %v3068_v1  ;;  %v456_v4 = vld [vmem:[%s3317_s24] sm:$0xff]  ;;  %v2679_v5 = vpack.c.bf16 %v449_v3, %v448_v2  ;;  %v451_v7 = vld [vmem:[%s3607_s2 + $0x8] sm:$0xff]  ;;  %vm741_vm2 = vcmask 261120   ;;  %v605_v22 = vlaneseq  ;;  %s3635_s20 = sld [smem:[#allocation13_spill]] }
  0x84   : > { %2460 = vmatprep.mubr.msk.f32.mxu0 %vm470_vm1, %v456_v4  ;;  %v450_v6 = vld [vmem:[%s3607_s2] sm:$0xff]  ;;  %v457_v8 = vld [vmem:[%s3317_s24 + $0x8] sm:$0xff]  ;;  %v452_v10 = vld [vmem:[%s3607_s2 + $0x10] sm:$0xff]  ;;  %v3069_v20 = vmov 1983009808   ;;  %s3636_s29 = sld [smem:[#allocation14_spill]] }
  0x85   : > { %2680 = vmatprep.subr.bf16.mxu0 %v2679_v5  ;;  %v3343_v9 = vpack.c.bf16 %v451_v7, %v450_v6  ;;  %v453_v11 = vld [vmem:[%s3607_s2 + $0x18] sm:$0xff]  ;;  %v458_v12 = vld [vmem:[%s3317_s24 + $0x10] sm:$0xff]  ;;  %v460_v15 = vld [vmem:[%s3317_s24 + $0x20] sm:$0xff]  ;;  %v603_v21 = vunpack.c.l.s4 %v3069_v20  ;;  %v606_v26 = vshrl.u32 %v605_v22, 7  ;;  %v3070_v28 = vmov 1934713408  }
  0x86   : > { %2682 = vmatpush3.bf16.msra.mxu0 %v2679_v5  ;;  %v3354_v13 = vpack.c.bf16 %v453_v11, %v452_v10  ;;  %v459_v14 = vld [vmem:[%s3317_s24 + $0x18] sm:$0xff]  ;;  %v2317_v16 = vld [vmem:[%s3609_s4] ss:$0 sm:$0xff]  ;;  %v461_v17 = vld [vmem:[%s3317_s24 + $0x28] sm:$0xff]  ;;  %v667_v29 = vunpack.c.l.s4 %v3070_v28  ;;  %p444_p5 = scmp.lt.s32.totalorder %s3150_s21, 1  ;;  %s3637_s13 = sld [smem:[#allocation15_spill]] }
  0x87   : > { %2695 = vmatprep.subr.bf16.mxu0 %v3066_v0  ;;  %2685 = vmatpush3.bf16.msra.mxu1 %v3343_v9  ;;  %v462_v18 = vld [vmem:[%s3317_s24 + $0x30] sm:$0xff]  ;;  %v463_v19 = vld [vmem:[%s3317_s24 + $0x38] sm:$0xff]  ;;  %v604_v25 = vunpack.c.0.s8 %v603_v21  ;;  %v2308_v27 = vld [vmem:[%s3608_s3] ss:$0 sm:$0xff]  ;;  %vm2197_vm3 = vcmask 64512  }
  0x88   : > { %2686 = vmatprep.subr.bf16.mxu1 %v3066_v0  ;;  %v668_v37 = vunpack.c.0.s8 %v667_v29  ;;  %s3644_s21 = smov (!%p444_p5, %s3150_s21), 1 }
  0x89   : > { %2461 = vmatmul.mubr.msk.f32.vlgmr.msra.gmra.mrb[0].mxu0 %vm470_vm1, %v457_v8  ;;  %v607_v33 = vsub.s32 %v604_v25, %v606_v26  ;;  %s2307_s22 = sshll.u32 %s3644_s21, 3 }
  0x8a   : > { %2463 = vmatprep.mubr.msk.f32.mxu0 %vm470_vm1, %v458_v12  ;;  %2697 = vmatpush3.bf16.msra.mxu0 %v3343_v9  ;;  %v671_v50 = vsub.s32 %v668_v37, %v606_v26 }
  0x8b   : > { %2698 = vmatprep.subr.bf16.mxu0 %v3066_v0  ;;  %2688 = vmatpush3.bf16.msra.mxu1 %v3354_v13 }
  0x8c   : > { %2689 = vmatprep.subr.bf16.mxu1 %v3066_v0  ;;  %s447_s25 = scalar_lea.vmem %s3637_s13, %s2307_s22 }
  0x8d   : > { %2464 = vmatmul.mubr.msk.f32.gmra.mrb[2].mxu0 %vm470_vm1, %v459_v14 }
  0x8e   : > { %2466 = vmatprep.mubr.msk.f32.mxu0 %vm470_vm1, %v460_v15  ;;  %2700 = vmatpush3.bf16.msra.mxu0 %v3354_v13 }
  0x8f   : > { %2481 = vmatmul.mubr.msk.f32.vlgmr.msra.gmra.mrb[0].mxu1 %vm741_vm2, %v2317_v16  ;;  %2707 = vmatprep.subr.bf16.mxu0 %v3066_v0 }
  0x90   : > { %2691 = vmatpush3.bf16.msra.mxu1 %v3343_v9  ;;  %2491 = vmatprep.mubr.msk.f32.mxu1 %vm3067_vm0, %v3068_v1 }
  0x91   : > { %2467 = vmatmul.mubr.msk.f32.gmra.mrb[4].mxu0 %vm470_vm1, %v461_v17  ;;  %2692 = vmatprep.subr.bf16.mxu1 %v3066_v0 }
  0x92   : > { %2469 = vmatprep.mubr.msk.f32.mxu0 %vm470_vm1, %v462_v18 }
  0x94   : > { %2694 = vmatpush3.bf16.msra.mxu1 %v3354_v13 }
  0x95   : > { %2470 = vmatmul.mubr.msk.f32.gmra.mrb[6].mxu0 %vm470_vm1, %v463_v19  ;;  %2701 = vmatprep.subr.bf16.mxu1 %v3066_v0 }
  0x96   : > { %2502 = vmatprep.mubr.msk.f32.mxu0 %vm3067_vm0, %v3068_v1 }
 0x15c   : > { %v2462_v23 = vpop.f32.mrb[0].mxu0 }
 0x15d   : > { %v561_v24 = vpop.f32.mrb[1].mxu0  ;;  %v567_v31 = vadd.f32 %v2462_v23, %v2308_v27 }
 0x15e   : > { %v562_v35 = vadd.f32 %v2308_v27, %v561_v24 }
 0x160   : > { %v2465_v30 = vpop.f32.mrb[2].mxu0 }
 0x161   : > { %v577_v32 = vadd.f32 %v2465_v30, %v2308_v27  ;;  %v571_v34 = vpop.f32.mrb[3].mxu0 }
 0x162   : > { %v572_v36 = vadd.f32 %v2308_v27, %v571_v34  ;;  %v810_v38 = vpop.f32.mrb[0].mxu1 }
 0x163   : > { %v616_v39 = vcombine.low %v567_v31, %v577_v32  ;;  %v617_v40 = vcombine.high %v567_v31, %v577_v32  ;;  %v2482_v41 = vpop.f32.mrb[1].mxu1 }
 0x164   : > { %v600_v42 = vcombine.low %v562_v35, %v572_v36  ;;  %v601_v43 = vcombine.high %v562_v35, %v572_v36  ;;  %v2468_v44 = vpop.f32.mrb[4].mxu0 }
 0x165   : > { %v624_v45 = vrot.slane %v616_v39, %v607_v33  ;;  %v631_v46 = vrot.slane %v617_v40, %v607_v33  ;;  %v581_v47 = vpop.f32.mrb[5].mxu0  ;;  %v587_v56 = vadd.f32 %v2468_v44, %v2308_v27 }
 0x166   : > { %v608_v48 = vrot.slane %v600_v42, %v607_v33  ;;  %v615_v49 = vrot.slane %v601_v43, %v607_v33  ;;  %v582_v59 = vadd.f32 %v2308_v27, %v581_v47  ;;  %v1356_v47 = vld [vmem:[#allocation7] sm:$0xff] }
 0x168   : > { %v2471_v51 = vpop.f32.mrb[6].mxu0  ;;  %v664_v52 = vcombine.low %v608_v48, %v624_v45  ;;  %v665_v53 = vcombine.high %v608_v48, %v624_v45  ;;  %v680_v54 = vcombine.low %v615_v49, %v631_v46  ;;  %v681_v55 = vcombine.high %v615_v49, %v631_v46  ;;  %v1357_v48 = vld [vmem:[#allocation7 + $0x8] sm:$0xff] }
 0x169   : > { %v597_v57 = vadd.f32 %v2471_v51, %v2308_v27  ;;  %v591_v58 = vpop.f32.mrb[7].mxu0  ;;  %v2731_v49 = vpack.c.bf16 %v1357_v48, %v1356_v47 }
 0x16a   : > { %v592_v60 = vadd.f32 %v2308_v27, %v591_v58  ;;  %v3390_v61 = vrot.slane %v665_v53, %v671_v50  ;;  %v3392_v62 = vrot.slane %v680_v54, %v671_v50  ;;  %v3394_v3 = vrot.slane %v681_v55, %v671_v50  ;;  %v1359_v53 = vld [vmem:[#allocation7 + $0x18] sm:$0xff] }
 0x16b   : > { %v648_v63 = vcombine.low %v587_v56, %v597_v57  ;;  %v649_v2 = vcombine.high %v587_v56, %v597_v57  ;;  %v672_v16 = vrot.slane %v664_v52, %v671_v50 }
 0x16c   : > { %v632_v4 = vcombine.low %v582_v59, %v592_v60  ;;  %v633_v5 = vcombine.high %v582_v59, %v592_v60 }
 0x16d   : > { %v656_v6 = vrot.slane %v648_v63, %v607_v33  ;;  %v663_v7 = vrot.slane %v649_v2, %v607_v33  ;;  %v1362_v2 = vld [vmem:[%s3611_s6 + $0x10] sm:$0xff] }
 0x16e   : > { %v640_v8 = vrot.slane %v632_v4, %v607_v33  ;;  %v647_v10 = vrot.slane %v633_v5, %v607_v33  ;;  %v1363_v4 = vld [vmem:[%s3611_s6 + $0x18] sm:$0xff] }
 0x16f   : > { %v3477_v5 = vpack.c.bf16 %v1363_v4, %v1362_v2 }
 0x170   : > { %v696_v11 = vcombine.low %v640_v8, %v656_v6  ;;  %v697_v12 = vcombine.high %v640_v8, %v656_v6  ;;  %v712_v14 = vcombine.low %v647_v10, %v663_v7  ;;  %v713_v15 = vcombine.high %v647_v10, %v663_v7 }
 0x172   : > { %v704_v17 = vrot.slane %v696_v11, %v671_v50  ;;  %v711_v18 = vrot.slane %v697_v12, %v671_v50  ;;  %v3396_v19 = vrot.slane %v712_v14, %v671_v50  ;;  %v3398_v20 = vrot.slane %v713_v15, %v671_v50 }
 0x174   : > { %v728_v21 = vcombine.low %v672_v16, %v704_v17  ;;  %v729_v22 = vcombine.high %v672_v16, %v704_v17  ;;  %v730_v23 = vcombine.low %v3390_v61, %v711_v18  ;;  %v731_v24 = vcombine.high %v3390_v61, %v711_v18  ;;  %v1360_v61 = vld [vmem:[%s3611_s6] sm:$0xff] }
 0x175   : > { %v732_v25 = vcombine.low %v3392_v62, %v3396_v19  ;;  %v733_v26 = vcombine.high %v3392_v62, %v3396_v19  ;;  %v734_v27 = vcombine.low %v3394_v3, %v3398_v20  ;;  %v735_v28 = vcombine.high %v3394_v3, %v3398_v20  ;;  %v1361_v62 = vld [vmem:[%s3611_s6 + $0x8] sm:$0xff]  ;;  %v2335_v18 = vld [vmem:[%s3613_s8] ss:$0 sm:$0xff] }
 0x176   : > { %v814_v29 = vadd.f32 %v810_v38, %v728_v21  ;;  %v3467_v63 = vpack.c.bf16 %v1361_v62, %v1360_v61  ;;  %v2114_v61 = vld [vmem:[%s3636_s29 + $0x8] sm:$0xff] }
 0x178   : > { %2870 = vtanh.f32 %v814_v29 }
 0x182   : > { %v2871_v30 = vpop.eup %2870 }
 0x183   : > { %816 = vst.msk [vmem:[#allocation2] sm:$0xff] %vm741_vm2, %v2871_v30  ;;  %2492 = vmatmul.mubr.msk.f32.vlgmr.msra.gmra.mrb[2].mxu1 %vm741_vm2, %v2871_v30 }
 0x184   : > { %2703 = vmatpush3.bf16.msra.mxu1 %v3343_v9  ;;  %2513 = vmatprep.mubr.msk.f32.mxu1 %vm3067_vm0, %v3068_v1 }
 0x185   : > { %2704 = vmatprep.subr.bf16.mxu1 %v3066_v0 }
 0x188   : > { %2706 = vmatpush3.bf16.msra.mxu1 %v3354_v13 }
 0x189   : > { %2713 = vmatprep.subr.bf16.mxu1 %v3066_v0 }
 0x256   : > { %v886_v31 = vpop.f32.mrb[2].mxu1 }
 0x257   : > { %v890_v32 = vadd.f32 %v886_v31, %v729_v22  ;;  %v2493_v33 = vpop.f32.mrb[3].mxu1 }
 0x259   : > { %2872 = vtanh.f32 %v890_v32 }
 0x263   : > { %v2873_v34 = vpop.eup %2872 }
 0x264   : > { %893 = vst.msk [vmem:[#allocation2 + $0x8] sm:$0xff] %vm741_vm2, %v2873_v34  ;;  %2503 = vmatmul.mubr.msk.f32.vlgmr.msra.gmra.mrb[8].mxu0 %vm741_vm2, %v2873_v34 }
 0x265   : > { %2709 = vmatpush3.bf16.msra.mxu0 %v3343_v9  ;;  %2524 = vmatprep.mubr.msk.f32.mxu0 %vm3067_vm0, %v3068_v1 }
 0x266   : > { %2710 = vmatprep.subr.bf16.mxu0 %v3066_v0 }
 0x269   : > { %2712 = vmatpush3.bf16.msra.mxu0 %v3354_v13 }
 0x26a   : > { %2719 = vmatprep.subr.bf16.mxu0 %v3066_v0 }
 0x26b   : > { %v1367_v56 = vld [vmem:[#allocation2 + $0x8] sm:$0xff] }
 0x337   : > { %v963_v35 = vpop.f32.mrb[8].mxu0 }
 0x338   : > { %v967_v36 = vadd.f32 %v963_v35, %v730_v23  ;;  %v2504_v37 = vpop.f32.mrb[9].mxu0 }
 0x33a   : > { %2874 = vtanh.f32 %v967_v36 }
 0x344   : > { %v2875_v38 = vpop.eup %2874 }
 0x345   : > { %970 = vst.msk [vmem:[#allocation2 + $0x10] sm:$0xff] %vm741_vm2, %v2875_v38  ;;  %2514 = vmatmul.mubr.msk.f32.vlgmr.msra.gmra.mrb[4].mxu1 %vm741_vm2, %v2875_v38 }
 0x346   : > { %2715 = vmatpush3.bf16.msra.mxu1 %v3343_v9  ;;  %2535 = vmatprep.mubr.msk.f32.mxu1 %vm3067_vm0, %v3068_v1 }
 0x347   : > { %2716 = vmatprep.subr.bf16.mxu1 %v3066_v0 }
 0x34a   : > { %2718 = vmatpush3.bf16.msra.mxu1 %v3354_v13 }
 0x34b   : > { %2725 = vmatprep.subr.bf16.mxu1 %v3066_v0 }
 0x34c   : > { %v1368_v57 = vld [vmem:[#allocation2 + $0x10] sm:$0xff] }
 0x418   : > { %v1040_v39 = vpop.f32.mrb[4].mxu1 }
 0x419   : > { %v1044_v40 = vadd.f32 %v1040_v39, %v731_v24  ;;  %v2515_v41 = vpop.f32.mrb[5].mxu1  ;;  %v3515_v24 = vld [vmem:[%s3635_s20] ss:$0 sm:$0xff] }
 0x41b   : > { %2876 = vtanh.f32 %v1044_v40 }
 0x425   : > { %v2877_v42 = vpop.eup %2876 }
 0x426   : > { %1047 = vst.msk [vmem:[#allocation2 + $0x18] sm:$0xff] %vm741_vm2, %v2877_v42  ;;  %2525 = vmatmul.mubr.msk.f32.vlgmr.msra.gmra.mrb[10].mxu0 %vm741_vm2, %v2877_v42 }
 0x427   : > { %2721 = vmatpush3.bf16.msra.mxu0 %v3343_v9  ;;  %2546 = vmatprep.mubr.msk.f32.mxu0 %vm3067_vm0, %v3068_v1 }
 0x428   : > { %2722 = vmatprep.subr.bf16.mxu0 %v3066_v0 }
 0x42b   : > { %2724 = vmatpush3.bf16.msra.mxu0 %v3354_v13 }
 0x42c   : > { %2732 = vmatprep.subr.bf16.mxu0 %v2731_v49 }
 0x42d   : > { %v1369_v58 = vld [vmem:[#allocation2 + $0x18] sm:$0xff] }
 0x4f9   : > { %v1117_v43 = vpop.f32.mrb[10].mxu0 }
 0x4fa   : > { %v1121_v44 = vadd.f32 %v1117_v43, %v732_v25  ;;  %v2526_v45 = vpop.f32.mrb[11].mxu0 }
 0x4fc   : > { %2878 = vtanh.f32 %v1121_v44 }
 0x506   : > { %v2879_v46 = vpop.eup %2878 }
 0x507   : > { %1124 = vst.msk [vmem:[#allocation2 + $0x20] sm:$0xff] %vm741_vm2, %v2879_v46  ;;  %2536 = vmatmul.mubr.msk.f32.vlgmr.msra.gmra.mrb[6].mxu1 %vm741_vm2, %v2879_v46 }
 0x508   : > { %2727 = vmatpush3.bf16.msra.mxu1 %v3343_v9  ;;  %2557 = vmatprep.mubr.msk.f32.mxu1 %vm3067_vm0, %v3068_v1  ;;  %v1358_v9 = vld [vmem:[#allocation7 + $0x10] sm:$0xff] }
 0x509   : > { %2728 = vmatprep.subr.bf16.mxu1 %v3066_v0  ;;  %v2735_v54 = vpack.c.bf16 %v1359_v53, %v1358_v9 }
 0x50c   : > { %2730 = vmatpush3.bf16.msra.mxu1 %v3354_v13  ;;  %v1366_v13 = vld [vmem:[#allocation2] sm:$0xff] }
 0x50d   : > { %2739 = vmatprep.subr.bf16.mxu1 %v3066_v0 }
 0x50e   : > { %v1370_v59 = vld [vmem:[#allocation2 + $0x20] sm:$0xff] }
 0x5da   : > { %v1194_v50 = vpop.f32.mrb[6].mxu1 }
 0x5db   : > { %v1198_v51 = vadd.f32 %v1194_v50, %v733_v26  ;;  %v2537_v52 = vpop.f32.mrb[7].mxu1 }
 0x5dd   : > { %2880 = vtanh.f32 %v1198_v51 }
 0x5e7   : > { %v2881_v55 = vpop.eup %2880 }
 0x5e8   : > { %1201 = vst.msk [vmem:[#allocation2 + $0x28] sm:$0xff] %vm741_vm2, %v2881_v55  ;;  %2547 = vmatmul.mubr.msk.f32.vlgmr.msra.gmra.mrb[12].mxu0 %vm741_vm2, %v2881_v55 }
 0x5e9   : > { %2734 = vmatpush3.bf16.msra.mxu0 %v2731_v49  ;;  %2568 = vmatprep.mubr.msk.f32.mxu0 %vm741_vm2, %v1366_v13 }
 0x5ea   : > { %2736 = vmatprep.subr.bf16.mxu0 %v2735_v54 }
 0x5ed   : > { %2738 = vmatpush3.bf16.msra.mxu0 %v2735_v54 }
 0x5ee   : > { %2751 = vmatprep.subr.bf16.mxu0 %v3066_v0 }
 0x5ef   : > { %v1371_v60 = vld [vmem:[#allocation2 + $0x28] sm:$0xff] }
 0x5f0   : > { %2569 = vmatmul.mubr.msk.f32.vlgmr.msra.gmra.mrb[14].mxu0 %vm741_vm2, %v1367_v56 }
 0x5f1   : > { %2571 = vmatprep.mubr.msk.f32.mxu0 %vm741_vm2, %v1368_v57  ;;  %2753 = vmatpush3.bf16.msra.mxu0 %v3467_v63 }
 0x5f2   : > { %2754 = vmatprep.subr.bf16.mxu0 %v3066_v0 }
 0x5f4   : > { %2572 = vmatmul.mubr.msk.f32.gmra.mrb[16].mxu0 %vm741_vm2, %v1369_v58 }
 0x5f5   : > { %2574 = vmatprep.mubr.msk.f32.mxu0 %vm741_vm2, %v1370_v59  ;;  %2756 = vmatpush3.bf16.msra.mxu0 %v3477_v5 }
 0x5f6   : > { %2763 = vmatprep.subr.bf16.mxu0 %v3066_v0 }
 0x5f8   : > { %2575 = vmatmul.mubr.msk.f32.gmra.mrb[18].mxu0 %vm741_vm2, %v1371_v60  ;;  %v2113_v60 = vld [vmem:[%s3636_s29] sm:$0xff] }
 0x5f9   : > { %v2788_v62 = vpack.c.bf16 %v2114_v61, %v2113_v60 }
 0x6bb   : > { %v1271_v6 = vpop.f32.mrb[12].mxu0 }
 0x6bc   : > { %v1275_v7 = vadd.f32 %v1271_v6, %v734_v27  ;;  %v2548_v8 = vpop.f32.mrb[13].mxu0 }
 0x6be   : > { %2882 = vtanh.f32 %v1275_v7 }
 0x6c3   : > { %v2570_v10 = vpop.f32.mrb[14].mxu0 }
 0x6c4   : > { %v1470_v11 = vpop.f32.mrb[15].mxu0  ;;  %v1476_v3 = vadd.f32 %v2570_v10, %v3515_v24  ;;  %v2344_v10 = vld [vmem:[#allocation8] ss:$0 sm:$0xff] }
 0x6c5   : > { %v1471_v25 = vadd.f32 %v3515_v24, %v1470_v11 }
 0x6c7   : > { %v3484_v12 = vpop.f32.mrb[16].mxu0 }
 0x6c8   : > { %v2883_v14 = vpop.eup %2882  ;;  %v1480_v15 = vpop.f32.mrb[17].mxu0  ;;  %v1486_v42 = vadd.f32 %v3484_v12, %v3515_v24 }
 0x6c9   : > { %1278 = vst.msk [vmem:[#allocation2 + $0x30] sm:$0xff] %vm741_vm2, %v2883_v14  ;;  %2558 = vmatmul.mubr.msk.f32.vlgmr.msra.gmra.mrb[8].mxu1 %vm741_vm2, %v2883_v14  ;;  %v1481_v37 = vadd.f32 %v3515_v24, %v1480_v15 }
 0x6ca   : > { %2741 = vmatpush3.bf16.msra.mxu1 %v3467_v63  ;;  %2588 = vmatprep.mubr.msk.f32.mxu1 %vm3067_vm0, %v3068_v1 }
 0x6cb   : > { %v3491_v16 = vpop.f32.mrb[18].mxu0  ;;  %2742 = vmatprep.subr.bf16.mxu1 %v3066_v0 }
 0x6cc   : > { %v3494_v17 = vpop.f32.mrb[19].mxu0  ;;  %v1496_v52 = vadd.f32 %v3491_v16, %v3515_v24 }
 0x6cd   : > { %v1491_v47 = vadd.f32 %v3515_v24, %v3494_v17 }
 0x6ce   : > { %2744 = vmatpush3.bf16.msra.mxu1 %v3477_v5 }
 0x6cf   : > { %2745 = vmatprep.subr.bf16.mxu1 %v3066_v0 }
 0x6d0   : > { %v1372_v19 = vld [vmem:[#allocation2 + $0x30] sm:$0xff] }
 0x6d1   : > { %2589 = vmatmul.mubr.msk.f32.vlgmr.msra.gmra.mrb[10].mxu1 %vm741_vm2, %v2335_v18  ;;  %2577 = vmatprep.mubr.msk.f32.mxu0 %vm741_vm2, %v1372_v19 }
 0x6d2   : > { %2747 = vmatpush3.bf16.msra.mxu1 %v3467_v63  ;;  %2599 = vmatprep.mubr.msk.f32.mxu1 %vm3067_vm0, %v3068_v1 }
 0x6d3   : > { %2748 = vmatprep.subr.bf16.mxu1 %v3066_v0 }
 0x6d6   : > { %2750 = vmatpush3.bf16.msra.mxu1 %v3477_v5 }
 0x6d7   : > { %2757 = vmatprep.subr.bf16.mxu1 %v3066_v0 }
 0x79c   : > { %v1348_v21 = vpop.f32.mrb[8].mxu1 }
 0x79d   : > { %v1352_v22 = vadd.f32 %v1348_v21, %v735_v28  ;;  %v2559_v23 = vpop.f32.mrb[9].mxu1 }
 0x79f   : > { %2884 = vtanh.f32 %v1352_v22 }
 0x7a4   : > { %v1582_v26 = vpop.f32.mrb[10].mxu1 }
 0x7a5   : > { %v1586_v27 = vadd.f32 %v1582_v26, %v1471_v25  ;;  %v2590_v29 = vpop.f32.mrb[11].mxu1 }
 0x7a7   : > { %2886 = vtanh.f32 %v1586_v27 }
 0x7a9   : > { %v2885_v30 = vpop.eup %2884 }
 0x7aa   : > { %1355 = vst.msk [vmem:[#allocation2 + $0x38] sm:$0xff] %vm741_vm2, %v2885_v30 }
 0x7b1   : > { %v2887_v31 = vpop.eup %2886  ;;  %v1373_v32 = vld [vmem:[#allocation2 + $0x38] sm:$0xff] }
 0x7b2   : > { %2600 = vmatmul.mubr.msk.f32.vlgmr.msra.gmra.mrb[12].mxu1 %vm741_vm2, %v2887_v31  ;;  %2578 = vmatmul.mubr.msk.f32.gmra.mrb[20].mxu0 %vm741_vm2, %v1373_v32 }
 0x7b3   : > { %2610 = vmatprep.mubr.msk.f32.mxu0 %vm3067_vm0, %v3068_v1  ;;  %2759 = vmatpush3.bf16.msra.mxu1 %v3467_v63 }
 0x7b4   : > { %2760 = vmatprep.subr.bf16.mxu1 %v3066_v0  ;;  %2621 = vmatprep.mubr.msk.f32.mxu1 %vm3067_vm0, %v3068_v1 }
 0x7b7   : > { %2762 = vmatpush3.bf16.msra.mxu1 %v3477_v5 }
 0x7b8   : > { %2769 = vmatprep.subr.bf16.mxu1 %v3066_v0 }
 0x885   : > { %v1657_v20 = vpop.f32.mrb[12].mxu1  ;;  %v3530_v28 = vpop.f32.mrb[20].mxu0 }
 0x886   : > { %v1661_v33 = vadd.f32 %v1657_v20, %v1476_v3  ;;  %v2601_v34 = vpop.f32.mrb[13].mxu1  ;;  %v1500_v35 = vpop.f32.mrb[21].mxu0  ;;  %v1506_v4 = vadd.f32 %v3530_v28, %v3515_v24 }
 0x887   : > { %v1501_v13 = vadd.f32 %v3515_v24, %v1500_v35 }
 0x888   : > { %2888 = vtanh.f32 %v1661_v33 }
 0x892   : > { %v2889_v36 = vpop.eup %2888 }
 0x893   : > { %2611 = vmatmul.mubr.msk.f32.vlgmr.msra.gmra.mrb[22].mxu0 %vm741_vm2, %v2889_v36 }
 0x894   : > { %2765 = vmatpush3.bf16.msra.mxu0 %v3467_v63  ;;  %2632 = vmatprep.mubr.msk.f32.mxu0 %vm3067_vm0, %v3068_v1 }
 0x895   : > { %2766 = vmatprep.subr.bf16.mxu0 %v3066_v0 }
 0x898   : > { %2768 = vmatpush3.bf16.msra.mxu0 %v3477_v5 }
 0x899   : > { %2775 = vmatprep.subr.bf16.mxu0 %v3066_v0 }
 0x966   : > { %v1732_v38 = vpop.f32.mrb[22].mxu0 }
 0x967   : > { %v1736_v39 = vadd.f32 %v1732_v38, %v1481_v37  ;;  %v2612_v40 = vpop.f32.mrb[23].mxu0 }
 0x969   : > { %2890 = vtanh.f32 %v1736_v39 }
 0x973   : > { %v2891_v41 = vpop.eup %2890 }
 0x974   : > { %2622 = vmatmul.mubr.msk.f32.vlgmr.msra.gmra.mrb[14].mxu1 %vm741_vm2, %v2891_v41 }
 0x975   : > { %2771 = vmatpush3.bf16.msra.mxu1 %v3467_v63  ;;  %2643 = vmatprep.mubr.msk.f32.mxu1 %vm3067_vm0, %v3068_v1 }
 0x976   : > { %2772 = vmatprep.subr.bf16.mxu1 %v3066_v0 }
 0x979   : > { %2774 = vmatpush3.bf16.msra.mxu1 %v3477_v5 }
 0x97a   : > { %2781 = vmatprep.subr.bf16.mxu1 %v3066_v0 }
 0xa47   : > { %v1807_v43 = vpop.f32.mrb[14].mxu1 }
 0xa48   : > { %v1811_v44 = vadd.f32 %v1807_v43, %v1486_v42  ;;  %v2623_v45 = vpop.f32.mrb[15].mxu1 }
 0xa4a   : > { %2892 = vtanh.f32 %v1811_v44 }
 0xa54   : > { %v2893_v46 = vpop.eup %2892 }
 0xa55   : > { %2633 = vmatmul.mubr.msk.f32.vlgmr.msra.gmra.mrb[24].mxu0 %vm741_vm2, %v2893_v46 }
 0xa56   : > { %2777 = vmatpush3.bf16.msra.mxu0 %v3467_v63  ;;  %2654 = vmatprep.mubr.msk.f32.mxu0 %vm3067_vm0, %v3068_v1 }
 0xa57   : > { %2778 = vmatprep.subr.bf16.mxu0 %v3066_v0 }
 0xa5a   : > { %2780 = vmatpush3.bf16.msra.mxu0 %v3477_v5 }
 0xa5b   : > { %2787 = vmatprep.subr.bf16.mxu0 %v3066_v0 }
 0xb28   : > { %v1882_v48 = vpop.f32.mrb[24].mxu0 }
 0xb29   : > { %v1886_v49 = vadd.f32 %v1882_v48, %v1491_v47  ;;  %v2634_v50 = vpop.f32.mrb[25].mxu0 }
 0xb2b   : > { %2894 = vtanh.f32 %v1886_v49 }
 0xb35   : > { %v2895_v51 = vpop.eup %2894 }
 0xb36   : > { %2644 = vmatmul.mubr.msk.f32.vlgmr.msra.gmra.mrb[16].mxu1 %vm741_vm2, %v2895_v51 }
 0xb37   : > { %2783 = vmatpush3.bf16.msra.mxu1 %v3467_v63  ;;  %2665 = vmatprep.mubr.msk.f32.mxu1 %vm3067_vm0, %v3068_v1  ;;  %v2116_v63 = vld [vmem:[%s3636_s29 + $0x18] sm:$0xff] }
 0xb38   : > { %2784 = vmatprep.subr.bf16.mxu1 %v3066_v0 }
 0xb3b   : > { %2786 = vmatpush3.bf16.msra.mxu1 %v3477_v5 }
 0xc09   : > { %v1957_v9 = vpop.f32.mrb[16].mxu1 }
 0xc0a   : > { %v1961_v53 = vadd.f32 %v1957_v9, %v1496_v52  ;;  %v2645_v54 = vpop.f32.mrb[17].mxu1 }
 0xc0c   : > { %2896 = vtanh.f32 %v1961_v53 }
 0xc16   : > { %v2897_v55 = vpop.eup %2896 }
 0xc17   : > { %2655 = vmatmul.mubr.msk.f32.vlgmr.msra.gmra.mrb[26].mxu0 %vm741_vm2, %v2897_v55 }
 0xc18   : > { %2676 = vmatprep.mubr.msk.f32.mxu0 %vm3067_vm0, %v3068_v1  ;;  %v2115_v1 = vld [vmem:[%s3636_s29 + $0x10] sm:$0xff]  ;;  %2789 = vmatpush3.bf16.msra.mxu0 %v2788_v62 }
 0xc19   : > { %v2791_v2 = vpack.c.bf16 %v2116_v63, %v2115_v1  ;;  %2790 = vmatprep.subr.bf16.mxu0 %v3066_v0 }
 0xc1c   : > { %2792 = vmatpush3.bf16.msra.mxu0 %v2791_v2 }
 0xcea   : > { %v2032_v56 = vpop.f32.mrb[26].mxu0 }
 0xceb   : > { %v2036_v57 = vadd.f32 %v2032_v56, %v1501_v13  ;;  %v2656_v58 = vpop.f32.mrb[27].mxu0 }
 0xced   : > { %2898 = vtanh.f32 %v2036_v57 }
 0xcf7   : > { %v2899_v59 = vpop.eup %2898 }
 0xcf8   : > { %2666 = vmatmul.mubr.msk.f32.vlgmr.msra.gmra.mrb[18].mxu1 %vm741_vm2, %v2899_v59 }
 0xdcb   : > { %v2107_v5 = vpop.f32.mrb[18].mxu1 }
 0xdcc   : > { %v2111_v6 = vadd.f32 %v2107_v5, %v1506_v4  ;;  %v2667_v7 = vpop.f32.mrb[19].mxu1 }
 0xdce   : > { %2900 = vtanh.f32 %v2111_v6 }
 0xdd8   : > { %v2901_v8 = vpop.eup %2900 }
 0xdd9   : > { %2677 = vmatmul.mubr.msk.f32.vlgmr.msra.gmra.mrb[28].mxu0 %vm741_vm2, %v2901_v8 }
 0xeac   : > { %v2193_v0 = vpop.f32.mrb[28].mxu0 }
 0xead   : > { %v2194_v11 = vadd.f32 %v2344_v10, %v2193_v0  ;;  %v2678_v12 = vpop.f32.mrb[29].mxu0 }
 0xeaf   : > { %2198 = vst.msk [vmem:[%s447_s25] sm:$0xff] %vm2197_vm3, %v2194_v11 }
 0xeb0 PF: > { %s3638_s28 = smov %s3258_s17  ;;  %p23_p9 = scmp.ge.s32.totalorder %s3258_s17, 4  }
 0xeb1   : > { %s3639_s17 = smov %s3050_s18  ;;  %s3640_s18 = smov %s3054_s19 }
 0xeb2   : > { %s3641_s19 = smov %s3268_s26  ;;  %s3642_s20 = smov %s3638_s28 }
 0xeb3   :  { %25 = sbr.rel (!%p23_p9) target bundleno = 9 (0x9), region = 123 }
 0xeba   :  { %2218 = vsyncpa [#allocation4], 1 }
 0xebb   :  { %2220 = vsyncpa [#allocation4 + $0x1], 1 }
 0xebc   :  { %2221 = vsyncpa [#allocation6], 1 }
 0xebd   :  { %2222 = vsyncpa [#allocation9], 1 }

</bundles_post_ra>
